<compile_context>
chip_gen: v6e
topology: v6e:2x2x1
jax: 0.10.0
libtpu: 0.0.40
codegen_flags: <defaults>
</compile_context>

<pallas_src>
import jax
import jax.numpy as jnp
from jax import lax
from jax.experimental import pallas as pl
from jax.experimental.pallas import tpu as pltpu


# ----------------------------- config (synthetic) -----------------------------
ENC_HIDDEN_SIZE = 32          # config.enc_hidden_size
NZ = 8                        # config.Nz
INPUT_SIZE = 5                # fixed by the module (nn.LSTM(5, ...))
INPUT_SIZE_PAD = 8            # padded feature dim (per direction) inside the kernel
SEQ_LEN = 8
BATCH = 2

H = ENC_HIDDEN_SIZE
H8 = 8 * H                    # 256 gate lanes (4 gates x 2 directions x H)
OUT_PAD = 4 * H               # 128-lane padded packed output [z | mu | sigma_hat | 0...]

# parameter-blob row layout (all segments 8-row aligned, lane width = 256)
R_WIH = 0                                  # (2*Fpad, 8H) combined fwd/bwd x-projection
R_WHH = R_WIH + 2 * INPUT_SIZE_PAD         # (2H, 8H)   block-structured recurrence weight
R_WHEAD = R_WHH + 2 * H                    # (2H, 8H)   fused/duplicated head weight
R_MISC = R_WHEAD + 2 * H                   # 8 rows: row0 = bih, row1 = bhead
BLOB_ROWS = R_MISC + 8                     # 152


# --------------------------------- kernel ------------------------------------
def encoder_rnn_kernel(
    x_ref,        # (T*B, 2*Fpad)  per-step combined [x[s] | x[T-1-s]] features
    p_ref,        # (152, 256)     packed parameter blob (see layout above)
    noise_ref,    # (B, 128)       std-normal noise in lanes [0, Nz), zeros elsewhere
    out_ref,      # (B, 128)       packed [z | mu | sigma_hat | 0...]
):
    TB = x_ref.shape[0]
    B = out_ref.shape[0]
    T = TB // B
    H8_ = p_ref.shape[1]          # 8H = 256
    H2 = H8_ // 4                 # 2H = 64
    HALF = H8_ // 2               # 128

    # ---- static views into the single parameter blob (one DMA'd VMEM input) ----
    wih = p_ref[R_WIH:R_WHH, :]           # (16, 256)
    whh = p_ref[R_WHH:R_WHEAD, :]         # (64, 256)  loop-invariant recurrence RHS
    whead = p_ref[R_WHEAD:R_MISC, :]      # (64, 256)
    misc = p_ref[R_MISC:R_MISC + 8, :]    # (8, 256)   aligned 8-row segment
    bih = misc[0:1, :]                    # folded (b_ih + b_hh), both directions
    bhead = misc[1:2, :]

    # ---- hoisted projection: ONE matmul gives gx for all steps & both directions ----
    gx = jnp.dot(x_ref[...], wih, preferred_element_type=jnp.float32) + bih   # (T*B, 256)

    h = jnp.zeros((B, H2), jnp.float32)   # [h_fwd | h_bwd]
    c = jnp.zeros((B, H2), jnp.float32)   # [c_fwd | c_bwd]

    # ---- fused bidirectional recurrence, fully unrolled (T is compile-time) ----
    # Gate lanes are grouped [i(2H) | f(2H) | g(2H) | o(2H)]; the 0.5 input scale for
    # i/f/o is folded into wih/bih/whh so a SINGLE tanh pass gives all activations:
    #   sigmoid(raw) = 0.5*tanh(raw/2) + 0.5 ; tanh(raw_g) directly (g columns unscaled).
    for s in range(T):
        gates = gx[s * B:(s + 1) * B, :] + jnp.dot(
            h, whh, preferred_element_type=jnp.float32)          # (B, 256)
        t = jnp.tanh(gates)                                       # one EUP pass
        i_s = 0.5 * t[:, 0 * H2:1 * H2] + 0.5
        f_s = 0.5 * t[:, 1 * H2:2 * H2] + 0.5
        g_s = t[:, 2 * H2:3 * H2]
        o_s = 0.5 * t[:, 3 * H2:4 * H2] + 0.5
        c = f_s * c + i_s * g_s
        h = o_s * jnp.tanh(c)

    # ---- fused heads + reparameterization, shuffle-free packed epilogue ----
    # head = [mu | mu | sigma | 0... (lanes 0..127) || sigma | 0... (lanes 128..255)]
    head = jnp.dot(h, whead, preferred_element_type=jnp.float32) + bhead      # (B, 256)
    # lanes 0..7: mu + exp(sigma/2)*noise = z ; 8..15: mu ; 16..23: sigma ; rest: 0
    out_ref[...] = head[:, :HALF] + jnp.exp(0.5 * head[:, HALF:]) * noise_ref[...]


# --------------------------------- wrapper -----------------------------------
@jax.jit
def encoder_rnn_forward(x, blob, noise):
    """x: (T, B, 5) float32 (seq-major, like PyTorch nn.LSTM).
    Returns (z, mu, sigma_hat), each (B, Nz)."""
    T, B, F = x.shape
    x32 = x.astype(jnp.float32)

    # per-step combined features: row s*B+b = [x[s,b] (pad to 8) | x[T-1-s,b] (pad to 8)]
    x_comb = jnp.zeros((T * B, 2 * INPUT_SIZE_PAD), jnp.float32)
    x_comb = x_comb.at[:, :F].set(x32.reshape(T * B, F))
    x_comb = x_comb.at[:, INPUT_SIZE_PAD:INPUT_SIZE_PAD + F].set(
        x32[::-1].reshape(T * B, F))

    # noise placed in lanes [0, Nz) of a 128-lane row; other lanes zero
    noise_pad = jnp.zeros((B, OUT_PAD), jnp.float32).at[:, :NZ].set(
        noise.astype(jnp.float32))

    vmem = pl.BlockSpec(memory_space=pltpu.MemorySpace.VMEM)
    out = pl.pallas_call(
        encoder_rnn_kernel,
        out_shape=jax.ShapeDtypeStruct((B, OUT_PAD), jnp.float32),
        in_specs=[vmem, vmem, vmem],
        out_specs=vmem,
    )(x_comb, blob, noise_pad)

    z = out[:, 0 * NZ:1 * NZ]
    mu = out[:, 1 * NZ:2 * NZ]
    sigma_hat = out[:, 2 * NZ:3 * NZ]
    return z, mu, sigma_hat


# --------------------------- parameter construction ---------------------------
def _scatter_gate_cols(w_nat, d, h):
    """w_nat: (K, 4H) in PyTorch gate order [i f g o] for direction d (0=fwd, 1=bwd).
    Returns (K, 8H) in the fused grouped-gate layout [i_f i_b f_f f_b g_f g_b o_f o_b],
    with only direction-d columns filled (rest zero)."""
    K = w_nat.shape[0]
    out = jnp.zeros((K, 8 * h), w_nat.dtype)
    for k in range(4):
        out = out.at[:, k * 2 * h + d * h: k * 2 * h + (d + 1) * h].set(
            w_nat[:, k * h:(k + 1) * h])
    return out


def init_params(key):
    """Deterministic synthetic parameters.  Returns (raw PyTorch-shaped params for the
    reference, single packed kernel parameter blob)."""
    ks = jax.random.split(key, 12)
    scale = 0.1

    def rn(k, shape):
        return scale * jax.random.normal(k, shape, dtype=jnp.float32)

    raw = {}
    for prefix, off in (("f", 0), ("b", 4)):
        raw[f"w_ih_{prefix}"] = rn(ks[off + 0], (4 * H, INPUT_SIZE))  # weight_ih_l0[_reverse]
        raw[f"w_hh_{prefix}"] = rn(ks[off + 1], (4 * H, H))           # weight_hh_l0[_reverse]
        raw[f"b_ih_{prefix}"] = rn(ks[off + 2], (4 * H,))
        raw[f"b_hh_{prefix}"] = rn(ks[off + 3], (4 * H,))
    raw["w_mu"] = rn(ks[8], (NZ, 2 * H))      # fc_mu.weight
    raw["b_mu"] = rn(ks[9], (NZ,))
    raw["w_sig"] = rn(ks[10], (NZ, 2 * H))    # fc_sigma.weight
    raw["b_sig"] = rn(ks[11], (NZ,))

    # ---- combined x-projection (2*Fpad, 8H): rows 0..4 fwd w_ih, rows 8..12 bwd w_ih ----
    wih = jnp.zeros((2 * INPUT_SIZE_PAD, H8), jnp.float32)
    wih = wih.at[:INPUT_SIZE, :].set(_scatter_gate_cols(raw["w_ih_f"].T, 0, H))
    wih = wih.at[INPUT_SIZE_PAD:INPUT_SIZE_PAD + INPUT_SIZE, :].set(
        _scatter_gate_cols(raw["w_ih_b"].T, 1, H))

    # folded biases (b_ih + b_hh), both directions in one 256-lane row
    bih = (_scatter_gate_cols((raw["b_ih_f"] + raw["b_hh_f"])[None, :], 0, H)
           + _scatter_gate_cols((raw["b_ih_b"] + raw["b_hh_b"])[None, :], 1, H))  # (1, 8H)

    # block-structured recurrence weight: rows [:H] = fwd h, rows [H:] = bwd h
    whh = jnp.zeros((2 * H, H8), jnp.float32)
    whh = whh.at[:H, :].set(_scatter_gate_cols(raw["w_hh_f"].T, 0, H))
    whh = whh.at[H:, :].set(_scatter_gate_cols(raw["w_hh_b"].T, 1, H))

    # ---- fold the 0.5 input scale of sigmoid(x)=0.5*tanh(x/2)+0.5 into i/f/o columns ----
    col = jnp.arange(H8)
    is_g = (col >= 4 * H) & (col < 6 * H)                  # g-gate block
    col_scale = jnp.where(is_g, 1.0, 0.5).astype(jnp.float32)
    wih = wih * col_scale
    bih = bih * col_scale
    whh = whh * col_scale

    # ---- fused head weight, laid out for the shuffle-free packed epilogue ----
    # lanes 0..7 -> mu (z base), 8..15 -> mu, 16..23 -> sigma, 128..135 -> sigma (exp arg)
    whead = jnp.zeros((2 * H, H8), jnp.float32)
    whead = whead.at[:, 0 * NZ:1 * NZ].set(raw["w_mu"].T)
    whead = whead.at[:, 1 * NZ:2 * NZ].set(raw["w_mu"].T)
    whead = whead.at[:, 2 * NZ:3 * NZ].set(raw["w_sig"].T)
    whead = whead.at[:, 4 * H:4 * H + NZ].set(raw["w_sig"].T)
    bhead = jnp.zeros((H8,), jnp.float32)
    bhead = bhead.at[0 * NZ:1 * NZ].set(raw["b_mu"])
    bhead = bhead.at[1 * NZ:2 * NZ].set(raw["b_mu"])
    bhead = bhead.at[2 * NZ:3 * NZ].set(raw["b_sig"])
    bhead = bhead.at[4 * H:4 * H + NZ].set(raw["b_sig"])

    # ---- single lane-dense parameter blob (one VMEM input / one prologue DMA) ----
    blob = jnp.zeros((BLOB_ROWS, H8), jnp.float32)
    blob = blob.at[R_WIH:R_WHH, :].set(wih)
    blob = blob.at[R_WHH:R_WHEAD, :].set(whh)
    blob = blob.at[R_WHEAD:R_MISC, :].set(whead)
    blob = blob.at[R_MISC, :].set(bih[0])
    blob = blob.at[R_MISC + 1, :].set(bhead)
    return raw, blob


# ------------------------------ pure-JAX reference ----------------------------
def reference_forward(x, raw, noise):
    """Mirror of the PyTorch module, computed directly from the raw (un-fused) weights."""
    T, B, _ = x.shape

    def run_dir(xs, w_ih, w_hh, b_ih, b_hh):
        def step(carry, x_t):
            h_, c_ = carry
            gates = x_t @ w_ih.T + h_ @ w_hh.T + b_ih + b_hh
            i = jax.nn.sigmoid(gates[:, 0 * H:1 * H])
            f = jax.nn.sigmoid(gates[:, 1 * H:2 * H])
            g = jnp.tanh(gates[:, 2 * H:3 * H])
            o = jax.nn.sigmoid(gates[:, 3 * H:4 * H])
            c_new = f * c_ + i * g
            h_new = o * jnp.tanh(c_new)
            return (h_new, c_new), None

        init = (jnp.zeros((B, H), jnp.float32), jnp.zeros((B, H), jnp.float32))
        (h_last, _), _ = lax.scan(step, init, xs)
        return h_last

    h_f = run_dir(x, raw["w_ih_f"], raw["w_hh_f"], raw["b_ih_f"], raw["b_hh_f"])
    h_b = run_dir(x[::-1], raw["w_ih_b"], raw["w_hh_b"], raw["b_ih_b"], raw["b_hh_b"])
    hidden_cat = jnp.concatenate([h_f, h_b], axis=1)
    mu = hidden_cat @ raw["w_mu"].T + raw["b_mu"]
    sigma_hat = hidden_cat @ raw["w_sig"].T + raw["b_sig"]
    z = mu + jnp.exp(sigma_hat / 2.0) * noise
    return z, mu, sigma_hat


# ----------------------------------- main -------------------------------------
if __name__ == "__main__":
    key = jax.random.PRNGKey(0)
    k_param, k_x, k_noise = jax.random.split(key, 3)

    raw_params, kernel_blob = init_params(k_param)
    # inputs: (seq_len, batch, 5) like the PyTorch LSTM input
    x = jax.random.normal(k_x, (SEQ_LEN, BATCH, INPUT_SIZE), dtype=jnp.float32)
    # deterministic noise stands in for torch.normal(...) in the reparameterization
    # TODO(synk): torch.normal inside forward is replaced by an explicit noise input.
    noise = jax.random.normal(k_noise, (BATCH, NZ), dtype=jnp.float32)

    z, mu, sigma_hat = encoder_rnn_forward(x, kernel_blob, noise)
    jax.block_until_ready((z, mu, sigma_hat))

    z_ref, mu_ref, sh_ref = reference_forward(x, raw_params, noise)
    # slightly looser atol than v1 to absorb ~1e-7-level drift from the
    # sigmoid-via-tanh identity with the folded 0.5 scaling
    assert jnp.allclose(mu, mu_ref, atol=3e-5, rtol=2e-4), float(jnp.max(jnp.abs(mu - mu_ref)))
    assert jnp.allclose(sigma_hat, sh_ref, atol=3e-5, rtol=2e-4), float(jnp.max(jnp.abs(sigma_hat - sh_ref)))
    assert jnp.allclose(z, z_ref, atol=3e-5, rtol=2e-4), float(jnp.max(jnp.abs(z - z_ref)))

    print("KERNEL_OK")
</pallas_src>

<mosaic_0001>
module attributes {stable_mosaic.version = 11 : i64} {
  func.func @encoder_rnn_kernel(%arg0: memref<16x16xf32, #tpu.memory_space<vmem>>, %arg1: memref<152x256xf32, #tpu.memory_space<vmem>>, %arg2: memref<2x128xf32, #tpu.memory_space<vmem>>, %arg3: memref<2x128xf32, #tpu.memory_space<vmem>>) attributes {dimension_semantics = [], scalar_prefetch = 0 : i64, scratch_operands = 0 : i64, tpu.core_type = #tpu.core_type<tc>} {
    %c0 = arith.constant 0 : index
    %c0_0 = arith.constant 0 : index
    %0 = vector.load %arg1[%c0, %c0_0] : memref<152x256xf32, #tpu.memory_space<vmem>>, vector<16x256xf32>
    %c16 = arith.constant 16 : index
    %c0_1 = arith.constant 0 : index
    %1 = vector.load %arg1[%c16, %c0_1] : memref<152x256xf32, #tpu.memory_space<vmem>>, vector<64x256xf32>
    %c80 = arith.constant 80 : index
    %c0_2 = arith.constant 0 : index
    %2 = vector.load %arg1[%c80, %c0_2] : memref<152x256xf32, #tpu.memory_space<vmem>>, vector<64x256xf32>
    %c144 = arith.constant 144 : index
    %c0_3 = arith.constant 0 : index
    %3 = vector.load %arg1[%c144, %c0_3] : memref<152x256xf32, #tpu.memory_space<vmem>>, vector<8x256xf32>
    %4 = vector.extract_strided_slice %3 {offsets = [0, 0], sizes = [1, 256], strides = [1, 1]} : vector<8x256xf32> to vector<1x256xf32>
    %5 = vector.extract_strided_slice %3 {offsets = [1, 0], sizes = [1, 256], strides = [1, 1]} : vector<8x256xf32> to vector<1x256xf32>
    %c0_4 = arith.constant 0 : index
    %c0_5 = arith.constant 0 : index
    %6 = vector.load %arg0[%c0_4, %c0_5] : memref<16x16xf32, #tpu.memory_space<vmem>>, vector<16x16xf32>
    %cst = arith.constant dense<0.000000e+00> : vector<16x256xf32>
    %7 = tpu.matmul %6, %0, %cst {dimension_numbers = #tpu.dot_dimension_numbers<[1], [0], [0], [1], [0, 0, 1, 1], [], []>} : vector<16x16xf32>, vector<16x256xf32>, vector<16x256xf32> -> vector<16x256xf32>
    %8 = vector.broadcast %4 : vector<1x256xf32> to vector<16x256xf32>
    %9 = arith.addf %7, %8 : vector<16x256xf32>
    %cst_6 = arith.constant 0.000000e+00 : f32
    %10 = vector.broadcast %cst_6 : f32 to vector<2x64xf32>
    %cst_7 = arith.constant 0.000000e+00 : f32
    %11 = vector.broadcast %cst_7 : f32 to vector<2x64xf32>
    %12 = vector.extract_strided_slice %9 {offsets = [0, 0], sizes = [2, 256], strides = [1, 1]} : vector<16x256xf32> to vector<2x256xf32>
    %cst_8 = arith.constant dense<0.000000e+00> : vector<2x256xf32>
    %13 = tpu.matmul %10, %1, %cst_8 {dimension_numbers = #tpu.dot_dimension_numbers<[1], [0], [0], [1], [0, 0, 1, 1], [], []>} : vector<2x64xf32>, vector<64x256xf32>, vector<2x256xf32> -> vector<2x256xf32>
    %14 = arith.addf %12, %13 : vector<2x256xf32>
    %15 = math.tanh %14 : vector<2x256xf32>
    %16 = vector.extract_strided_slice %15 {offsets = [0, 0], sizes = [2, 64], strides = [1, 1]} : vector<2x256xf32> to vector<2x64xf32>
    %cst_9 = arith.constant 5.000000e-01 : f32
    %17 = vector.broadcast %cst_9 : f32 to vector<2x64xf32>
    %18 = arith.mulf %17, %16 : vector<2x64xf32>
    %cst_10 = arith.constant 5.000000e-01 : f32
    %19 = vector.broadcast %cst_10 : f32 to vector<2x64xf32>
    %20 = arith.addf %18, %19 : vector<2x64xf32>
    %21 = vector.extract_strided_slice %15 {offsets = [0, 64], sizes = [2, 64], strides = [1, 1]} : vector<2x256xf32> to vector<2x64xf32>
    %cst_11 = arith.constant 5.000000e-01 : f32
    %22 = vector.broadcast %cst_11 : f32 to vector<2x64xf32>
    %23 = arith.mulf %22, %21 : vector<2x64xf32>
    %cst_12 = arith.constant 5.000000e-01 : f32
    %24 = vector.broadcast %cst_12 : f32 to vector<2x64xf32>
    %25 = arith.addf %23, %24 : vector<2x64xf32>
    %26 = vector.extract_strided_slice %15 {offsets = [0, 128], sizes = [2, 64], strides = [1, 1]} : vector<2x256xf32> to vector<2x64xf32>
    %27 = vector.extract_strided_slice %15 {offsets = [0, 192], sizes = [2, 64], strides = [1, 1]} : vector<2x256xf32> to vector<2x64xf32>
    %cst_13 = arith.constant 5.000000e-01 : f32
    %28 = vector.broadcast %cst_13 : f32 to vector<2x64xf32>
    %29 = arith.mulf %28, %27 : vector<2x64xf32>
    %cst_14 = arith.constant 5.000000e-01 : f32
    %30 = vector.broadcast %cst_14 : f32 to vector<2x64xf32>
    %31 = arith.addf %29, %30 : vector<2x64xf32>
    %32 = arith.mulf %25, %11 : vector<2x64xf32>
    %33 = arith.mulf %20, %26 : vector<2x64xf32>
    %34 = arith.addf %32, %33 : vector<2x64xf32>
    %35 = math.tanh %34 : vector<2x64xf32>
    %36 = arith.mulf %31, %35 : vector<2x64xf32>
    %37 = vector.extract_strided_slice %9 {offsets = [2, 0], sizes = [2, 256], strides = [1, 1]} : vector<16x256xf32> to vector<2x256xf32>
    %cst_15 = arith.constant dense<0.000000e+00> : vector<2x256xf32>
    %38 = tpu.matmul %36, %1, %cst_15 {dimension_numbers = #tpu.dot_dimension_numbers<[1], [0], [0], [1], [0, 0, 1, 1], [], []>} : vector<2x64xf32>, vector<64x256xf32>, vector<2x256xf32> -> vector<2x256xf32>
    %39 = arith.addf %37, %38 : vector<2x256xf32>
    %40 = math.tanh %39 : vector<2x256xf32>
    %41 = vector.extract_strided_slice %40 {offsets = [0, 0], sizes = [2, 64], strides = [1, 1]} : vector<2x256xf32> to vector<2x64xf32>
    %cst_16 = arith.constant 5.000000e-01 : f32
    %42 = vector.broadcast %cst_16 : f32 to vector<2x64xf32>
    %43 = arith.mulf %42, %41 : vector<2x64xf32>
    %cst_17 = arith.constant 5.000000e-01 : f32
    %44 = vector.broadcast %cst_17 : f32 to vector<2x64xf32>
    %45 = arith.addf %43, %44 : vector<2x64xf32>
    %46 = vector.extract_strided_slice %40 {offsets = [0, 64], sizes = [2, 64], strides = [1, 1]} : vector<2x256xf32> to vector<2x64xf32>
    %cst_18 = arith.constant 5.000000e-01 : f32
    %47 = vector.broadcast %cst_18 : f32 to vector<2x64xf32>
    %48 = arith.mulf %47, %46 : vector<2x64xf32>
    %cst_19 = arith.constant 5.000000e-01 : f32
    %49 = vector.broadcast %cst_19 : f32 to vector<2x64xf32>
    %50 = arith.addf %48, %49 : vector<2x64xf32>
    %51 = vector.extract_strided_slice %40 {offsets = [0, 128], sizes = [2, 64], strides = [1, 1]} : vector<2x256xf32> to vector<2x64xf32>
    %52 = vector.extract_strided_slice %40 {offsets = [0, 192], sizes = [2, 64], strides = [1, 1]} : vector<2x256xf32> to vector<2x64xf32>
    %cst_20 = arith.constant 5.000000e-01 : f32
    %53 = vector.broadcast %cst_20 : f32 to vector<2x64xf32>
    %54 = arith.mulf %53, %52 : vector<2x64xf32>
    %cst_21 = arith.constant 5.000000e-01 : f32
    %55 = vector.broadcast %cst_21 : f32 to vector<2x64xf32>
    %56 = arith.addf %54, %55 : vector<2x64xf32>
    %57 = arith.mulf %50, %34 : vector<2x64xf32>
    %58 = arith.mulf %45, %51 : vector<2x64xf32>
    %59 = arith.addf %57, %58 : vector<2x64xf32>
    %60 = math.tanh %59 : vector<2x64xf32>
    %61 = arith.mulf %56, %60 : vector<2x64xf32>
    %62 = vector.extract_strided_slice %9 {offsets = [4, 0], sizes = [2, 256], strides = [1, 1]} : vector<16x256xf32> to vector<2x256xf32>
    %cst_22 = arith.constant dense<0.000000e+00> : vector<2x256xf32>
    %63 = tpu.matmul %61, %1, %cst_22 {dimension_numbers = #tpu.dot_dimension_numbers<[1], [0], [0], [1], [0, 0, 1, 1], [], []>} : vector<2x64xf32>, vector<64x256xf32>, vector<2x256xf32> -> vector<2x256xf32>
    %64 = arith.addf %62, %63 : vector<2x256xf32>
    %65 = math.tanh %64 : vector<2x256xf32>
    %66 = vector.extract_strided_slice %65 {offsets = [0, 0], sizes = [2, 64], strides = [1, 1]} : vector<2x256xf32> to vector<2x64xf32>
    %cst_23 = arith.constant 5.000000e-01 : f32
    %67 = vector.broadcast %cst_23 : f32 to vector<2x64xf32>
    %68 = arith.mulf %67, %66 : vector<2x64xf32>
    %cst_24 = arith.constant 5.000000e-01 : f32
    %69 = vector.broadcast %cst_24 : f32 to vector<2x64xf32>
    %70 = arith.addf %68, %69 : vector<2x64xf32>
    %71 = vector.extract_strided_slice %65 {offsets = [0, 64], sizes = [2, 64], strides = [1, 1]} : vector<2x256xf32> to vector<2x64xf32>
    %cst_25 = arith.constant 5.000000e-01 : f32
    %72 = vector.broadcast %cst_25 : f32 to vector<2x64xf32>
    %73 = arith.mulf %72, %71 : vector<2x64xf32>
    %cst_26 = arith.constant 5.000000e-01 : f32
    %74 = vector.broadcast %cst_26 : f32 to vector<2x64xf32>
    %75 = arith.addf %73, %74 : vector<2x64xf32>
    %76 = vector.extract_strided_slice %65 {offsets = [0, 128], sizes = [2, 64], strides = [1, 1]} : vector<2x256xf32> to vector<2x64xf32>
    %77 = vector.extract_strided_slice %65 {offsets = [0, 192], sizes = [2, 64], strides = [1, 1]} : vector<2x256xf32> to vector<2x64xf32>
    %cst_27 = arith.constant 5.000000e-01 : f32
    %78 = vector.broadcast %cst_27 : f32 to vector<2x64xf32>
    %79 = arith.mulf %78, %77 : vector<2x64xf32>
    %cst_28 = arith.constant 5.000000e-01 : f32
    %80 = vector.broadcast %cst_28 : f32 to vector<2x64xf32>
    %81 = arith.addf %79, %80 : vector<2x64xf32>
    %82 = arith.mulf %75, %59 : vector<2x64xf32>
    %83 = arith.mulf %70, %76 : vector<2x64xf32>
    %84 = arith.addf %82, %83 : vector<2x64xf32>
    %85 = math.tanh %84 : vector<2x64xf32>
    %86 = arith.mulf %81, %85 : vector<2x64xf32>
    %87 = vector.extract_strided_slice %9 {offsets = [6, 0], sizes = [2, 256], strides = [1, 1]} : vector<16x256xf32> to vector<2x256xf32>
    %cst_29 = arith.constant dense<0.000000e+00> : vector<2x256xf32>
    %88 = tpu.matmul %86, %1, %cst_29 {dimension_numbers = #tpu.dot_dimension_numbers<[1], [0], [0], [1], [0, 0, 1, 1], [], []>} : vector<2x64xf32>, vector<64x256xf32>, vector<2x256xf32> -> vector<2x256xf32>
    %89 = arith.addf %87, %88 : vector<2x256xf32>
    %90 = math.tanh %89 : vector<2x256xf32>
    %91 = vector.extract_strided_slice %90 {offsets = [0, 0], sizes = [2, 64], strides = [1, 1]} : vector<2x256xf32> to vector<2x64xf32>
    %cst_30 = arith.constant 5.000000e-01 : f32
    %92 = vector.broadcast %cst_30 : f32 to vector<2x64xf32>
    %93 = arith.mulf %92, %91 : vector<2x64xf32>
    %cst_31 = arith.constant 5.000000e-01 : f32
    %94 = vector.broadcast %cst_31 : f32 to vector<2x64xf32>
    %95 = arith.addf %93, %94 : vector<2x64xf32>
    %96 = vector.extract_strided_slice %90 {offsets = [0, 64], sizes = [2, 64], strides = [1, 1]} : vector<2x256xf32> to vector<2x64xf32>
    %cst_32 = arith.constant 5.000000e-01 : f32
    %97 = vector.broadcast %cst_32 : f32 to vector<2x64xf32>
    %98 = arith.mulf %97, %96 : vector<2x64xf32>
    %cst_33 = arith.constant 5.000000e-01 : f32
    %99 = vector.broadcast %cst_33 : f32 to vector<2x64xf32>
    %100 = arith.addf %98, %99 : vector<2x64xf32>
    %101 = vector.extract_strided_slice %90 {offsets = [0, 128], sizes = [2, 64], strides = [1, 1]} : vector<2x256xf32> to vector<2x64xf32>
    %102 = vector.extract_strided_slice %90 {offsets = [0, 192], sizes = [2, 64], strides = [1, 1]} : vector<2x256xf32> to vector<2x64xf32>
    %cst_34 = arith.constant 5.000000e-01 : f32
    %103 = vector.broadcast %cst_34 : f32 to vector<2x64xf32>
    %104 = arith.mulf %103, %102 : vector<2x64xf32>
    %cst_35 = arith.constant 5.000000e-01 : f32
    %105 = vector.broadcast %cst_35 : f32 to vector<2x64xf32>
    %106 = arith.addf %104, %105 : vector<2x64xf32>
    %107 = arith.mulf %100, %84 : vector<2x64xf32>
    %108 = arith.mulf %95, %101 : vector<2x64xf32>
    %109 = arith.addf %107, %108 : vector<2x64xf32>
    %110 = math.tanh %109 : vector<2x64xf32>
    %111 = arith.mulf %106, %110 : vector<2x64xf32>
    %112 = vector.extract_strided_slice %9 {offsets = [8, 0], sizes = [2, 256], strides = [1, 1]} : vector<16x256xf32> to vector<2x256xf32>
    %cst_36 = arith.constant dense<0.000000e+00> : vector<2x256xf32>
    %113 = tpu.matmul %111, %1, %cst_36 {dimension_numbers = #tpu.dot_dimension_numbers<[1], [0], [0], [1], [0, 0, 1, 1], [], []>} : vector<2x64xf32>, vector<64x256xf32>, vector<2x256xf32> -> vector<2x256xf32>
    %114 = arith.addf %112, %113 : vector<2x256xf32>
    %115 = math.tanh %114 : vector<2x256xf32>
    %116 = vector.extract_strided_slice %115 {offsets = [0, 0], sizes = [2, 64], strides = [1, 1]} : vector<2x256xf32> to vector<2x64xf32>
    %cst_37 = arith.constant 5.000000e-01 : f32
    %117 = vector.broadcast %cst_37 : f32 to vector<2x64xf32>
    %118 = arith.mulf %117, %116 : vector<2x64xf32>
    %cst_38 = arith.constant 5.000000e-01 : f32
    %119 = vector.broadcast %cst_38 : f32 to vector<2x64xf32>
    %120 = arith.addf %118, %119 : vector<2x64xf32>
    %121 = vector.extract_strided_slice %115 {offsets = [0, 64], sizes = [2, 64], strides = [1, 1]} : vector<2x256xf32> to vector<2x64xf32>
    %cst_39 = arith.constant 5.000000e-01 : f32
    %122 = vector.broadcast %cst_39 : f32 to vector<2x64xf32>
    %123 = arith.mulf %122, %121 : vector<2x64xf32>
    %cst_40 = arith.constant 5.000000e-01 : f32
    %124 = vector.broadcast %cst_40 : f32 to vector<2x64xf32>
    %125 = arith.addf %123, %124 : vector<2x64xf32>
    %126 = vector.extract_strided_slice %115 {offsets = [0, 128], sizes = [2, 64], strides = [1, 1]} : vector<2x256xf32> to vector<2x64xf32>
    %127 = vector.extract_strided_slice %115 {offsets = [0, 192], sizes = [2, 64], strides = [1, 1]} : vector<2x256xf32> to vector<2x64xf32>
    %cst_41 = arith.constant 5.000000e-01 : f32
    %128 = vector.broadcast %cst_41 : f32 to vector<2x64xf32>
    %129 = arith.mulf %128, %127 : vector<2x64xf32>
    %cst_42 = arith.constant 5.000000e-01 : f32
    %130 = vector.broadcast %cst_42 : f32 to vector<2x64xf32>
    %131 = arith.addf %129, %130 : vector<2x64xf32>
    %132 = arith.mulf %125, %109 : vector<2x64xf32>
    %133 = arith.mulf %120, %126 : vector<2x64xf32>
    %134 = arith.addf %132, %133 : vector<2x64xf32>
    %135 = math.tanh %134 : vector<2x64xf32>
    %136 = arith.mulf %131, %135 : vector<2x64xf32>
    %137 = vector.extract_strided_slice %9 {offsets = [10, 0], sizes = [2, 256], strides = [1, 1]} : vector<16x256xf32> to vector<2x256xf32>
    %cst_43 = arith.constant dense<0.000000e+00> : vector<2x256xf32>
    %138 = tpu.matmul %136, %1, %cst_43 {dimension_numbers = #tpu.dot_dimension_numbers<[1], [0], [0], [1], [0, 0, 1, 1], [], []>} : vector<2x64xf32>, vector<64x256xf32>, vector<2x256xf32> -> vector<2x256xf32>
    %139 = arith.addf %137, %138 : vector<2x256xf32>
    %140 = math.tanh %139 : vector<2x256xf32>
    %141 = vector.extract_strided_slice %140 {offsets = [0, 0], sizes = [2, 64], strides = [1, 1]} : vector<2x256xf32> to vector<2x64xf32>
    %cst_44 = arith.constant 5.000000e-01 : f32
    %142 = vector.broadcast %cst_44 : f32 to vector<2x64xf32>
    %143 = arith.mulf %142, %141 : vector<2x64xf32>
    %cst_45 = arith.constant 5.000000e-01 : f32
    %144 = vector.broadcast %cst_45 : f32 to vector<2x64xf32>
    %145 = arith.addf %143, %144 : vector<2x64xf32>
    %146 = vector.extract_strided_slice %140 {offsets = [0, 64], sizes = [2, 64], strides = [1, 1]} : vector<2x256xf32> to vector<2x64xf32>
    %cst_46 = arith.constant 5.000000e-01 : f32
    %147 = vector.broadcast %cst_46 : f32 to vector<2x64xf32>
    %148 = arith.mulf %147, %146 : vector<2x64xf32>
    %cst_47 = arith.constant 5.000000e-01 : f32
    %149 = vector.broadcast %cst_47 : f32 to vector<2x64xf32>
    %150 = arith.addf %148, %149 : vector<2x64xf32>
    %151 = vector.extract_strided_slice %140 {offsets = [0, 128], sizes = [2, 64], strides = [1, 1]} : vector<2x256xf32> to vector<2x64xf32>
    %152 = vector.extract_strided_slice %140 {offsets = [0, 192], sizes = [2, 64], strides = [1, 1]} : vector<2x256xf32> to vector<2x64xf32>
    %cst_48 = arith.constant 5.000000e-01 : f32
    %153 = vector.broadcast %cst_48 : f32 to vector<2x64xf32>
    %154 = arith.mulf %153, %152 : vector<2x64xf32>
    %cst_49 = arith.constant 5.000000e-01 : f32
    %155 = vector.broadcast %cst_49 : f32 to vector<2x64xf32>
    %156 = arith.addf %154, %155 : vector<2x64xf32>
    %157 = arith.mulf %150, %134 : vector<2x64xf32>
    %158 = arith.mulf %145, %151 : vector<2x64xf32>
    %159 = arith.addf %157, %158 : vector<2x64xf32>
    %160 = math.tanh %159 : vector<2x64xf32>
    %161 = arith.mulf %156, %160 : vector<2x64xf32>
    %162 = vector.extract_strided_slice %9 {offsets = [12, 0], sizes = [2, 256], strides = [1, 1]} : vector<16x256xf32> to vector<2x256xf32>
    %cst_50 = arith.constant dense<0.000000e+00> : vector<2x256xf32>
    %163 = tpu.matmul %161, %1, %cst_50 {dimension_numbers = #tpu.dot_dimension_numbers<[1], [0], [0], [1], [0, 0, 1, 1], [], []>} : vector<2x64xf32>, vector<64x256xf32>, vector<2x256xf32> -> vector<2x256xf32>
    %164 = arith.addf %162, %163 : vector<2x256xf32>
    %165 = math.tanh %164 : vector<2x256xf32>
    %166 = vector.extract_strided_slice %165 {offsets = [0, 0], sizes = [2, 64], strides = [1, 1]} : vector<2x256xf32> to vector<2x64xf32>
    %cst_51 = arith.constant 5.000000e-01 : f32
    %167 = vector.broadcast %cst_51 : f32 to vector<2x64xf32>
    %168 = arith.mulf %167, %166 : vector<2x64xf32>
    %cst_52 = arith.constant 5.000000e-01 : f32
    %169 = vector.broadcast %cst_52 : f32 to vector<2x64xf32>
    %170 = arith.addf %168, %169 : vector<2x64xf32>
    %171 = vector.extract_strided_slice %165 {offsets = [0, 64], sizes = [2, 64], strides = [1, 1]} : vector<2x256xf32> to vector<2x64xf32>
    %cst_53 = arith.constant 5.000000e-01 : f32
    %172 = vector.broadcast %cst_53 : f32 to vector<2x64xf32>
    %173 = arith.mulf %172, %171 : vector<2x64xf32>
    %cst_54 = arith.constant 5.000000e-01 : f32
    %174 = vector.broadcast %cst_54 : f32 to vector<2x64xf32>
    %175 = arith.addf %173, %174 : vector<2x64xf32>
    %176 = vector.extract_strided_slice %165 {offsets = [0, 128], sizes = [2, 64], strides = [1, 1]} : vector<2x256xf32> to vector<2x64xf32>
    %177 = vector.extract_strided_slice %165 {offsets = [0, 192], sizes = [2, 64], strides = [1, 1]} : vector<2x256xf32> to vector<2x64xf32>
    %cst_55 = arith.constant 5.000000e-01 : f32
    %178 = vector.broadcast %cst_55 : f32 to vector<2x64xf32>
    %179 = arith.mulf %178, %177 : vector<2x64xf32>
    %cst_56 = arith.constant 5.000000e-01 : f32
    %180 = vector.broadcast %cst_56 : f32 to vector<2x64xf32>
    %181 = arith.addf %179, %180 : vector<2x64xf32>
    %182 = arith.mulf %175, %159 : vector<2x64xf32>
    %183 = arith.mulf %170, %176 : vector<2x64xf32>
    %184 = arith.addf %182, %183 : vector<2x64xf32>
    %185 = math.tanh %184 : vector<2x64xf32>
    %186 = arith.mulf %181, %185 : vector<2x64xf32>
    %187 = vector.extract_strided_slice %9 {offsets = [14, 0], sizes = [2, 256], strides = [1, 1]} : vector<16x256xf32> to vector<2x256xf32>
    %cst_57 = arith.constant dense<0.000000e+00> : vector<2x256xf32>
    %188 = tpu.matmul %186, %1, %cst_57 {dimension_numbers = #tpu.dot_dimension_numbers<[1], [0], [0], [1], [0, 0, 1, 1], [], []>} : vector<2x64xf32>, vector<64x256xf32>, vector<2x256xf32> -> vector<2x256xf32>
    %189 = arith.addf %187, %188 : vector<2x256xf32>
    %190 = math.tanh %189 : vector<2x256xf32>
    %191 = vector.extract_strided_slice %190 {offsets = [0, 0], sizes = [2, 64], strides = [1, 1]} : vector<2x256xf32> to vector<2x64xf32>
    %cst_58 = arith.constant 5.000000e-01 : f32
    %192 = vector.broadcast %cst_58 : f32 to vector<2x64xf32>
    %193 = arith.mulf %192, %191 : vector<2x64xf32>
    %cst_59 = arith.constant 5.000000e-01 : f32
    %194 = vector.broadcast %cst_59 : f32 to vector<2x64xf32>
    %195 = arith.addf %193, %194 : vector<2x64xf32>
    %196 = vector.extract_strided_slice %190 {offsets = [0, 64], sizes = [2, 64], strides = [1, 1]} : vector<2x256xf32> to vector<2x64xf32>
    %cst_60 = arith.constant 5.000000e-01 : f32
    %197 = vector.broadcast %cst_60 : f32 to vector<2x64xf32>
    %198 = arith.mulf %197, %196 : vector<2x64xf32>
    %cst_61 = arith.constant 5.000000e-01 : f32
    %199 = vector.broadcast %cst_61 : f32 to vector<2x64xf32>
    %200 = arith.addf %198, %199 : vector<2x64xf32>
    %201 = vector.extract_strided_slice %190 {offsets = [0, 128], sizes = [2, 64], strides = [1, 1]} : vector<2x256xf32> to vector<2x64xf32>
    %202 = vector.extract_strided_slice %190 {offsets = [0, 192], sizes = [2, 64], strides = [1, 1]} : vector<2x256xf32> to vector<2x64xf32>
    %cst_62 = arith.constant 5.000000e-01 : f32
    %203 = vector.broadcast %cst_62 : f32 to vector<2x64xf32>
    %204 = arith.mulf %203, %202 : vector<2x64xf32>
    %cst_63 = arith.constant 5.000000e-01 : f32
    %205 = vector.broadcast %cst_63 : f32 to vector<2x64xf32>
    %206 = arith.addf %204, %205 : vector<2x64xf32>
    %207 = arith.mulf %200, %184 : vector<2x64xf32>
    %208 = arith.mulf %195, %201 : vector<2x64xf32>
    %209 = arith.addf %207, %208 : vector<2x64xf32>
    %210 = math.tanh %209 : vector<2x64xf32>
    %211 = arith.mulf %206, %210 : vector<2x64xf32>
    %cst_64 = arith.constant dense<0.000000e+00> : vector<2x256xf32>
    %212 = tpu.matmul %211, %2, %cst_64 {dimension_numbers = #tpu.dot_dimension_numbers<[1], [0], [0], [1], [0, 0, 1, 1], [], []>} : vector<2x64xf32>, vector<64x256xf32>, vector<2x256xf32> -> vector<2x256xf32>
    %213 = vector.broadcast %5 : vector<1x256xf32> to vector<2x256xf32>
    %214 = arith.addf %212, %213 : vector<2x256xf32>
    %215 = vector.extract_strided_slice %214 {offsets = [0, 0], sizes = [2, 128], strides = [1, 1]} : vector<2x256xf32> to vector<2x128xf32>
    %216 = vector.extract_strided_slice %214 {offsets = [0, 128], sizes = [2, 128], strides = [1, 1]} : vector<2x256xf32> to vector<2x128xf32>
    %cst_65 = arith.constant 5.000000e-01 : f32
    %217 = vector.broadcast %cst_65 : f32 to vector<2x128xf32>
    %218 = arith.mulf %217, %216 : vector<2x128xf32>
    %219 = math.exp %218 : vector<2x128xf32>
    %c0_66 = arith.constant 0 : index
    %c0_67 = arith.constant 0 : index
    %220 = vector.load %arg2[%c0_66, %c0_67] : memref<2x128xf32, #tpu.memory_space<vmem>>, vector<2x128xf32>
    %221 = arith.mulf %219, %220 : vector<2x128xf32>
    %222 = arith.addf %215, %221 : vector<2x128xf32>
    %c0_68 = arith.constant 0 : index
    %c0_69 = arith.constant 0 : index
    %223 = vector.load %arg3[%c0_68, %c0_69] : memref<2x128xf32, #tpu.memory_space<vmem>>, vector<2x128xf32>
    tpu.vector_store %arg3[%c0_68, %c0_69], %222 {strides = array<i32>} : memref<2x128xf32, #tpu.memory_space<vmem>>, vector<2x128xf32>,
    return
  }
}

</mosaic_0001>

<bundles_post_ra>
// kernel: encoder_rnn_forward.1
= control target key start
LH: loop header
LB: loop body
LE: loop exit
PB: predicated region body
PF: predicated region fallthrough
CT: control target
= control target key end

     0   :  { %8 = vsyncpa [#allocation3], 0  ;;  %s1149_s12 = smov [#allocation2]   ;;  %s1437_s0 = inlined_call_operand.vmem [shape: f32[16,16], index: 0, kind: input, shape index: {}]   ;;  %s1438_s1 = inlined_call_operand.hbm [shape: f32[152,256], index: 1, kind: input, shape index: {}]   ;;  %s1439_s2 = inlined_call_operand.vmem [shape: f32[2,128], index: 2, kind: input, shape index: {}]   ;;  %s1440_s3 = inlined_call_operand.vmem [shape: f32[2,128], index: 3, kind: output, shape index: {}]  }
   0x1   :  { %s16_s13 = sshll.u32 %s1149_s12, 4  ;;  %s17_s13 = int_to_ptr.vmem [resolvable:$true] %s16_s13 }
   0x2   :  { %s1135_s14 = scalar_lea.vmem %s17_s13, 4864  ;;  %p1140_p1 = scmp.lt.s32.totalorder %s17_s13, %s17_s13 }
   0x3   :  { %p1136_p0 = scmp.ne.s32.totalorder %s17_s13, %s1135_s14  ;;  %p1141_p2 = scmp.lt.s32.totalorder %s1135_s14, %s1135_s14 }
   0x5   :  { %p1142_p3 = por %p1141_p2, %p1140_p1 }
   0x7   :  { %p1143_p4 = pnand %p1142_p3, %p1136_p0 }
   0x9   :  { %1146 = shalt.err (!%p1143_p4)
}
   0xa   :  { %s1150_s15 = smov 256   ;;  %s1151_s16 = smov 16  }
   0xb   :  { %22 = dma.hbm_to_vmem [thread:$0]  %s1438_s1, 4864, %s17_s13, [#allocation3], %s1150_s15, %s1150_s15, %s1151_s16  }
   0xc   :  { %1147 = dma.done.wait [#allocation3], 4864  }
   0xd   :  { %1148 = vsyncadd [#allocation3], 4294962432  ;;  %v1152_v0 = vmov 0.0   ;;  %v1179_v1 = vld [vmem:[#allocation2 + $0x98] sm:$0xff]  ;;  %v1181_v2 = vld [vmem:[#allocation2 + $0x90] sm:$0xff]  ;;  %vm76_vm0 = vcmask 130048   ;;  %v68_v22 = vlaneseq }
   0xe   :  { %147 = vmatprep.mubr.f32.mxu0 %v1152_v0  ;;  %228 = vmatprep.mubr.f32.mxu1 %v1152_v0  ;;  %v1183_v3 = vld [vmem:[#allocation2 + $0x88] sm:$0xff]  ;;  %v1186_v4 = vld [vmem:[#allocation2 + $0x80] sm:$0xff]  ;;  %v1189_v5 = vld [vmem:[#allocation2 + $0x78] sm:$0xff]  ;;  %s1153_s20 = smov 64   ;;  %vm160_vm1 = vcmask 523264  }
   0xf   :  { %180 = vmatprep.subr.mxu1 %v1179_v1  ;;  %v31_v6 = vld [vmem:[#allocation2 + $0x18] sm:$0xff]  ;;  %v1192_v7 = vld [vmem:[#allocation2 + $0x70] sm:$0xff]  ;;  %v1195_v9 = vld [vmem:[#allocation2 + $0x68] sm:$0xff]  ;;  %v1268_v23 = vshrl.u32 %v68_v22, 7 }
  0x10   :  { %181 = vmatpush1.msra.mxu1 %v1181_v2  ;;  %111 = vmatprep.subr.mxu0 %v31_v6  ;;  %v30_v8 = vld [vmem:[#allocation2 + $0x10] sm:$0xff]  ;;  %v29_v10 = vld [vmem:[#allocation2 + $0x8] sm:$0xff]  ;;  %v28_v11 = vld [vmem:[#allocation2] sm:$0xff] }
  0x11   :  { %182 = vmatprep.subr.mxu1 %v1183_v3  ;;  %112 = vmatpush1.msra.mxu0 %v30_v8  ;;  %v1198_v12 = vld [vmem:[#allocation2 + $0x60] sm:$0xff]  ;;  %v1204_v14 = vld [vmem:[#allocation2 + $0x58] sm:$0xff]  ;;  %v1207_v15 = vld [vmem:[#allocation2 + $0x50] sm:$0xff]  ;;  %v70_v24 = vsub.s32 0, %v1268_v23 }
  0x12   :  { %183 = vmatpush1.msra.mxu1 %v1186_v4  ;;  %113 = vmatprep.subr.mxu0 %v29_v10  ;;  %v66_v13 = vld [vmem:[%s1437_s0] sm:$0xff]  ;;  %v1211_v16 = vld [vmem:[#allocation2 + $0x48] sm:$0xff]  ;;  %v1219_v18 = vld [vmem:[#allocation2 + $0x38] sm:$0xff] }
  0x13   :  { %184 = vmatprep.subr.mxu1 %v1189_v5  ;;  %114 = vmatpush1.msra.mxu0 %v28_v11  ;;  %v1215_v17 = vld [vmem:[#allocation2 + $0x40] sm:$0xff]  ;;  %v1223_v19 = vld [vmem:[#allocation2 + $0x30] sm:$0xff]  ;;  %v1227_v20 = vld [vmem:[#allocation2 + $0x28] sm:$0xff] }
  0x14   :  { %185 = vmatpush1.msra.mxu1 %v1192_v7  ;;  %1062 = vmatmul.mubr.msk.f32.vlgmr.msra.gmra.mxu0 %vm76_vm0, %v66_v13  ;;  %v1231_v21 = vld [vmem:[#allocation2 + $0x20] sm:$0xff]  ;;  %v1276_v28 = vld [vmem:[#allocation2 + $0x128] sm:$0xff] }
  0x15   :  { %186 = vmatprep.subr.mxu1 %v1195_v9  ;;  %273 = vmatprep.subr.mxu0 %v1179_v1  ;;  %v1271_v25 = vld [vmem:[#allocation2 + $0x120] sm:$0xff]  ;;  %v1282_v30 = vrot.slane %v1276_v28, %v70_v24  ;;  %v67_v42 = vld [vmem:[%s1437_s0 + $0x8] sm:$0xff] }
  0x16   :  { %187 = vmatpush1.msra.mxu1 %v1198_v12  ;;  %274 = vmatpush1.msra.mxu0 %v1181_v2  ;;  %v1274_v26 = vrot.slane %v1271_v25, %v70_v24 }
  0x17   :  { %188 = vmatprep.subr.mxu1 %v1204_v14  ;;  %275 = vmatprep.subr.mxu0 %v1183_v3 }
  0x18   :  { %189 = vmatpush1.msra.mxu1 %v1207_v15  ;;  %276 = vmatpush1.msra.mxu0 %v1186_v4 }
  0x19   :  { %190 = vmatprep.subr.mxu1 %v1211_v16  ;;  %277 = vmatprep.subr.mxu0 %v1189_v5 }
  0x1a   :  { %191 = vmatpush1.msra.mxu1 %v1215_v17  ;;  %278 = vmatpush1.msra.mxu0 %v1192_v7 }
  0x1b   :  { %192 = vmatprep.subr.mxu1 %v1219_v18  ;;  %279 = vmatprep.subr.mxu0 %v1195_v9 }
  0x1c   :  { %193 = vmatpush1.msra.mxu1 %v1223_v19  ;;  %280 = vmatpush1.msra.mxu0 %v1198_v12 }
  0x1d   :  { %194 = vmatprep.subr.mxu1 %v1227_v20  ;;  %281 = vmatprep.subr.mxu0 %v1204_v14 }
  0x1e   :  { %195 = vmatpush1.msra.mxu1 %v1231_v21  ;;  %153 = vmatprep.mubr.f32.mxu0 %v1152_v0 }
  0x1f   :  { %229 = vmatmul.mubr.f32.vlgmr.msra.gmra.mxu1 %v1152_v0  ;;  %282 = vmatpush1.msra.mxu0 %v1207_v15 }
  0x20   :  { %376 = vmatprep.subr.mxu1 %v1179_v1  ;;  %283 = vmatprep.subr.mxu0 %v1211_v16 }
  0x21   :  { %377 = vmatpush1.msra.mxu1 %v1181_v2  ;;  %284 = vmatpush1.msra.mxu0 %v1215_v17 }
  0x22   :  { %378 = vmatprep.subr.mxu1 %v1183_v3  ;;  %285 = vmatprep.subr.mxu0 %v1219_v18 }
  0x23   :  { %379 = vmatpush1.msra.mxu1 %v1186_v4  ;;  %286 = vmatpush1.msra.mxu0 %v1223_v19 }
  0x24   :  { %380 = vmatprep.subr.mxu1 %v1189_v5  ;;  %287 = vmatprep.subr.mxu0 %v1227_v20 }
  0x25   :  { %381 = vmatpush1.msra.mxu1 %v1192_v7  ;;  %288 = vmatpush1.msra.mxu0 %v1231_v21 }
  0x26   :  { %382 = vmatprep.subr.mxu1 %v1195_v9  ;;  %424 = vmatprep.mubr.f32.mxu1 %v1152_v0 }
  0x27   :  { %383 = vmatpush1.msra.mxu1 %v1198_v12  ;;  %479 = vmatprep.subr.mxu0 %v1179_v1 }
  0x28   :  { %384 = vmatprep.subr.mxu1 %v1204_v14  ;;  %1063 = vmatmul.mubr.msk.f32.gmra.mxu0 %vm76_vm0, %v67_v42 }
  0x29   :  { %385 = vmatpush1.msra.mxu1 %v1207_v15  ;;  %321 = vmatprep.mubr.f32.mxu0 %v1152_v0 }
  0x2a   :  { %386 = vmatprep.subr.mxu1 %v1211_v16 }
  0x2b   :  { %387 = vmatpush1.msra.mxu1 %v1215_v17 }
  0x2c   :  { %388 = vmatprep.subr.mxu1 %v1219_v18 }
  0x2d   :  { %389 = vmatpush1.msra.mxu1 %v1223_v19 }
  0x2e   :  { %390 = vmatprep.subr.mxu1 %v1227_v20 }
  0x2f   :  { %391 = vmatpush1.msra.mxu1 %v1231_v21 }
  0x30   :  { %582 = vmatprep.subr.mxu1 %v1179_v1 }
  0xd4   :  { %v149_v27 = vpop.f32.mrf.mxu0 }
  0xd5   :  { %v1279_v29 = vadd.f32 %v149_v27, %v1274_v26 }
  0xd6   :  { %v151_v31 = vpop.f32.mrf.mxu0 }
  0xd7   :  { %v1285_v33 = vadd.f32 %v151_v31, %v1282_v30 }
  0xdf   :  { %v230_v32 = vpop.f32.mrf.mxu1 }
  0xe0   :  { %v235_v34 = vadd.f32 %v230_v32, %v1279_v29 }
  0xe1   :  { %v232_v35 = vpop.f32.mrf.mxu1 }
  0xe2   :  { %1077 = vtanh.f32 %v235_v34  ;;  %v236_v36 = vadd.f32 %v232_v35, %v1285_v33 }
  0xe4   :  { %1079 = vtanh.f32 %v236_v36 }
  0xe8   :  { %v1314_v51 = vpop.f32.mrf.mxu0 }
  0xea   :  { %v1316_v52 = vpop.f32.mrf.mxu0 }
  0xef   :  { %v1078_v37 = vpop.eup %1077 }
  0xf0   :  { %v239_v38 = vmul.f32 0.5, %v1078_v37 }
  0xf1   :  { %v1080_v40 = vpop.eup %1079 }
  0xf2   :  { %v240_v39 = vadd.f32 0.5, %v239_v38  ;;  %v241_v46 = vmul.f32 0.5, %v1080_v40 }
  0xf4   :  { %v244_v41 = vmul.f32 %v1080_v40, %v240_v39  ;;  %v243_v43 = vmul.f32 0.0, %v240_v39  ;;  %v242_v47 = vadd.f32 0.5, %v241_v46 }
  0xf6   :  { %246 = vrot.lane.b32.xlu0 %v244_v41, %s1153_s20 }
 0x168   :  { %v247_v44 = vpop.permute.xlu0 %246 }
 0x169   :  { %v249_v45 = vadd.f32 %v247_v44, %v243_v43 }
 0x16b   :  { %1081 = vtanh.f32 %v249_v45  ;;  %v343_v61 = vrot.slane %v249_v45, 6 }
 0x178   :  { %v1082_v48 = vpop.eup %1081 }
 0x179   :  { %v251_v49 = vmul.f32 %v1082_v48, %v242_v47 }
 0x17b   :  { %253 = vrot.lane.b32.xlu0 %v251_v49, %s1153_s20 }
 0x1ed   :  { %v254_v50 = vpop.permute.xlu0 %253 }
 0x1ee   :  { %1064 = vmatmul.mubr.msk.f32.vlgmr.msra.gmra.mxu0 %vm160_vm1, %v254_v50 }
 0x1ef   :  { %480 = vmatpush1.msra.mxu0 %v1181_v2  ;;  %527 = vmatprep.mubr.f32.mxu0 %v1152_v0 }
 0x1f0   :  { %481 = vmatprep.subr.mxu0 %v1183_v3 }
 0x1f1   :  { %482 = vmatpush1.msra.mxu0 %v1186_v4 }
 0x1f2   :  { %483 = vmatprep.subr.mxu0 %v1189_v5 }
 0x1f3   :  { %484 = vmatpush1.msra.mxu0 %v1192_v7 }
 0x1f4   :  { %485 = vmatprep.subr.mxu0 %v1195_v9 }
 0x1f5   :  { %486 = vmatpush1.msra.mxu0 %v1198_v12 }
 0x1f6   :  { %487 = vmatprep.subr.mxu0 %v1204_v14 }
 0x1f7   :  { %488 = vmatpush1.msra.mxu0 %v1207_v15 }
 0x1f8   :  { %489 = vmatprep.subr.mxu0 %v1211_v16 }
 0x1f9   :  { %490 = vmatpush1.msra.mxu0 %v1215_v17 }
 0x1fa   :  { %491 = vmatprep.subr.mxu0 %v1219_v18 }
 0x1fb   :  { %492 = vmatpush1.msra.mxu0 %v1223_v19 }
 0x1fc   :  { %493 = vmatprep.subr.mxu0 %v1227_v20 }
 0x1fd   :  { %494 = vmatpush1.msra.mxu0 %v1231_v21 }
 0x1fe   :  { %678 = vmatprep.subr.mxu0 %v1179_v1 }
 0x2ae   :  { %v323_v53 = vpop.f32.mrf.mxu0 }
 0x2af   :  { %v330_v54 = vrot.slane %v323_v53, 6 }
 0x2b0   :  { %v325_v55 = vpop.f32.mrf.mxu0 }
 0x2b1   :  { %v334_v56 = vadd.f32 %v330_v54, %v1279_v29  ;;  %v331_v57 = vrot.slane %v325_v55, 6 }
 0x2b3   :  { %1083 = vtanh.f32 %v334_v56  ;;  %v335_v58 = vadd.f32 %v331_v57, %v1285_v33 }
 0x2b5   :  { %1085 = vtanh.f32 %v335_v58 }
 0x2c0   :  { %v1084_v59 = vpop.eup %1083 }
 0x2c1   :  { %v338_v60 = vmul.f32 0.5, %v1084_v59 }
 0x2c2   :  { %v1086_v63 = vpop.eup %1085 }
 0x2c3   :  { %v339_v62 = vadd.f32 0.5, %v338_v60  ;;  %v340_v13 = vmul.f32 0.5, %v1086_v63 }
 0x2c5   :  { %v346_v6 = vmul.f32 %v1086_v63, %v339_v62  ;;  %v345_v8 = vmul.f32 %v343_v61, %v339_v62  ;;  %v341_v22 = vadd.f32 0.5, %v340_v13 }
 0x2c7   :  { %348 = vrot.lane.b32.xlu1 %v346_v6, %s1153_s20 }
 0x339   :  { %v349_v10 = vpop.permute.xlu1 %348 }
 0x33a   :  { %v351_v11 = vadd.f32 %v349_v10, %v345_v8 }
 0x33c   :  { %1087 = vtanh.f32 %v351_v11  ;;  %v446_v42 = vrot.slane %v351_v11, 6 }
 0x349   :  { %v1088_v24 = vpop.eup %1087 }
 0x34a   :  { %v353_v27 = vmul.f32 %v1088_v24, %v341_v22 }
 0x34c   :  { %v355_v31 = vrot.slane %v353_v27, 2 }
 0x34e   :  { %356 = vrot.lane.b32.xlu1 %v355_v31, %s1153_s20 }
 0x3c0   :  { %v357_v32 = vpop.permute.xlu1 %356 }
 0x3c1   :  { %1065 = vmatmul.mubr.msk.f32.vlgmr.msra.gmra.mxu1 %vm160_vm1, %v357_v32 }
 0x3c2   :  { %583 = vmatpush1.msra.mxu1 %v1181_v2  ;;  %630 = vmatprep.mubr.f32.mxu1 %v1152_v0 }
 0x3c3   :  { %584 = vmatprep.subr.mxu1 %v1183_v3 }
 0x3c4   :  { %585 = vmatpush1.msra.mxu1 %v1186_v4 }
 0x3c5   :  { %586 = vmatprep.subr.mxu1 %v1189_v5 }
 0x3c6   :  { %587 = vmatpush1.msra.mxu1 %v1192_v7 }
 0x3c7   :  { %588 = vmatprep.subr.mxu1 %v1195_v9 }
 0x3c8   :  { %589 = vmatpush1.msra.mxu1 %v1198_v12 }
 0x3c9   :  { %590 = vmatprep.subr.mxu1 %v1204_v14 }
 0x3ca   :  { %591 = vmatpush1.msra.mxu1 %v1207_v15 }
 0x3cb   :  { %592 = vmatprep.subr.mxu1 %v1211_v16 }
 0x3cc   :  { %593 = vmatpush1.msra.mxu1 %v1215_v17 }
 0x3cd   :  { %594 = vmatprep.subr.mxu1 %v1219_v18 }
 0x3ce   :  { %595 = vmatpush1.msra.mxu1 %v1223_v19 }
 0x3cf   :  { %596 = vmatprep.subr.mxu1 %v1227_v20 }
 0x3d0   :  { %597 = vmatpush1.msra.mxu1 %v1231_v21 }
 0x3d1   :  { %781 = vmatprep.subr.mxu1 %v1179_v1 }
 0x481   :  { %v426_v34 = vpop.f32.mrf.mxu1 }
 0x482   :  { %v433_v35 = vrot.slane %v426_v34, 4 }
 0x483   :  { %v428_v36 = vpop.f32.mrf.mxu1 }
 0x484   :  { %v437_v37 = vadd.f32 %v433_v35, %v1279_v29  ;;  %v434_v38 = vrot.slane %v428_v36, 4  ;;  %v1385_v35 = vadd.f32 %v1314_v51, %v1274_v26 }
 0x486   :  { %1089 = vtanh.f32 %v437_v37  ;;  %v438_v39 = vadd.f32 %v434_v38, %v1285_v33  ;;  %v1389_v37 = vadd.f32 %v1316_v52, %v1282_v30 }
 0x488   :  { %1091 = vtanh.f32 %v438_v39 }
 0x493   :  { %v1090_v40 = vpop.eup %1089 }
 0x494   :  { %v441_v41 = vmul.f32 0.5, %v1090_v40 }
 0x495   :  { %v1092_v44 = vpop.eup %1091 }
 0x496   :  { %v442_v43 = vadd.f32 0.5, %v441_v41  ;;  %v443_v49 = vmul.f32 0.5, %v1092_v44 }
 0x498   :  { %v449_v45 = vmul.f32 %v1092_v44, %v442_v43  ;;  %v448_v46 = vmul.f32 %v446_v42, %v442_v43  ;;  %v444_v50 = vadd.f32 0.5, %v443_v49 }
 0x49a   :  { %451 = vrot.lane.b32.xlu0 %v449_v45, %s1153_s20 }
 0x50c   :  { %v452_v47 = vpop.permute.xlu0 %451 }
 0x50d   :  { %v454_v48 = vadd.f32 %v452_v47, %v448_v46 }
 0x50f   :  { %1093 = vtanh.f32 %v454_v48  ;;  %v549_v8 = vrot.slane %v454_v48, 6 }
 0x51c   :  { %v1094_v53 = vpop.eup %1093 }
 0x51d   :  { %v456_v54 = vmul.f32 %v1094_v53, %v444_v50 }
 0x51f   :  { %v458_v55 = vrot.slane %v456_v54, 4 }
 0x521   :  { %459 = vrot.lane.b32.xlu1 %v458_v55, %s1153_s20 }
 0x593   :  { %v460_v56 = vpop.permute.xlu1 %459 }
 0x594   :  { %1066 = vmatmul.mubr.msk.f32.vlgmr.msra.gmra.mxu0 %vm160_vm1, %v460_v56 }
 0x595   :  { %679 = vmatpush1.msra.mxu0 %v1181_v2  ;;  %726 = vmatprep.mubr.f32.mxu0 %v1152_v0 }
 0x596   :  { %680 = vmatprep.subr.mxu0 %v1183_v3 }
 0x597   :  { %681 = vmatpush1.msra.mxu0 %v1186_v4 }
 0x598   :  { %682 = vmatprep.subr.mxu0 %v1189_v5 }
 0x599   :  { %683 = vmatpush1.msra.mxu0 %v1192_v7 }
 0x59a   :  { %684 = vmatprep.subr.mxu0 %v1195_v9 }
 0x59b   :  { %685 = vmatpush1.msra.mxu0 %v1198_v12 }
 0x59c   :  { %686 = vmatprep.subr.mxu0 %v1204_v14 }
 0x59d   :  { %687 = vmatpush1.msra.mxu0 %v1207_v15 }
 0x59e   :  { %688 = vmatprep.subr.mxu0 %v1211_v16 }
 0x59f   :  { %689 = vmatpush1.msra.mxu0 %v1215_v17 }
 0x5a0   :  { %690 = vmatprep.subr.mxu0 %v1219_v18 }
 0x5a1   :  { %691 = vmatpush1.msra.mxu0 %v1223_v19 }
 0x5a2   :  { %692 = vmatprep.subr.mxu0 %v1227_v20 }
 0x5a3   :  { %693 = vmatpush1.msra.mxu0 %v1231_v21 }
 0x5a4   :  { %884 = vmatprep.subr.mxu0 %v1179_v1 }
 0x654   :  { %v529_v57 = vpop.f32.mrf.mxu0 }
 0x655   :  { %v536_v58 = vrot.slane %v529_v57, 2 }
 0x656   :  { %v531_v59 = vpop.f32.mrf.mxu0 }
 0x657   :  { %v540_v60 = vadd.f32 %v536_v58, %v1279_v29  ;;  %v537_v61 = vrot.slane %v531_v59, 2 }
 0x659   :  { %1095 = vtanh.f32 %v540_v60  ;;  %v541_v62 = vadd.f32 %v537_v61, %v1285_v33 }
 0x65b   :  { %1097 = vtanh.f32 %v541_v62 }
 0x666   :  { %v1096_v63 = vpop.eup %1095 }
 0x667   :  { %v544_v6 = vmul.f32 0.5, %v1096_v63 }
 0x668   :  { %v1098_v11 = vpop.eup %1097 }
 0x669   :  { %v545_v10 = vadd.f32 0.5, %v544_v6  ;;  %v546_v27 = vmul.f32 0.5, %v1098_v11 }
 0x66b   :  { %v552_v13 = vmul.f32 %v1098_v11, %v545_v10  ;;  %v551_v22 = vmul.f32 %v549_v8, %v545_v10  ;;  %v547_v31 = vadd.f32 0.5, %v546_v27 }
 0x66d   :  { %554 = vrot.lane.b32.xlu0 %v552_v13, %s1153_s20 }
 0x6df   :  { %v555_v1 = vpop.permute.xlu0 %554 }
 0x6e0   :  { %v557_v24 = vadd.f32 %v555_v1, %v551_v22 }
 0x6e2   :  { %1099 = vtanh.f32 %v557_v24  ;;  %v646_v43 = vrot.slane %v557_v24, 6 }
 0x6ef   :  { %v1100_v29 = vpop.eup %1099 }
 0x6f0   :  { %v559_v32 = vmul.f32 %v1100_v29, %v547_v31 }
 0x6f2   :  { %v561_v34 = vrot.slane %v559_v32, 6 }
 0x6f4   :  { %562 = vrot.lane.b32.xlu1 %v561_v34, %s1153_s20 }
 0x766   :  { %v563_v33 = vpop.permute.xlu1 %562 }
 0x767   :  { %1067 = vmatmul.mubr.msk.f32.vlgmr.msra.gmra.mxu1 %vm160_vm1, %v563_v33 }
 0x768   :  { %782 = vmatpush1.msra.mxu1 %v1181_v2  ;;  %829 = vmatprep.mubr.f32.mxu1 %v1152_v0 }
 0x769   :  { %783 = vmatprep.subr.mxu1 %v1183_v3 }
 0x76a   :  { %784 = vmatpush1.msra.mxu1 %v1186_v4 }
 0x76b   :  { %785 = vmatprep.subr.mxu1 %v1189_v5 }
 0x76c   :  { %786 = vmatpush1.msra.mxu1 %v1192_v7 }
 0x76d   :  { %787 = vmatprep.subr.mxu1 %v1195_v9 }
 0x76e   :  { %788 = vmatpush1.msra.mxu1 %v1198_v12 }
 0x76f   :  { %789 = vmatprep.subr.mxu1 %v1204_v14 }
 0x770   :  { %790 = vmatpush1.msra.mxu1 %v1207_v15 }
 0x771   :  { %791 = vmatprep.subr.mxu1 %v1211_v16 }
 0x772   :  { %792 = vmatpush1.msra.mxu1 %v1215_v17 }
 0x773   :  { %793 = vmatprep.subr.mxu1 %v1219_v18 }
 0x774   :  { %794 = vmatpush1.msra.mxu1 %v1223_v19 }
 0x775   :  { %795 = vmatprep.subr.mxu1 %v1227_v20 }
 0x776   :  { %796 = vmatpush1.msra.mxu1 %v1231_v21 }
 0x827   :  { %v632_v36 = vpop.f32.mrf.mxu1 }
 0x828   :  { %v637_v38 = vadd.f32 %v632_v36, %v1385_v35 }
 0x829   :  { %v634_v39 = vpop.f32.mrf.mxu1 }
 0x82a   :  { %1101 = vtanh.f32 %v637_v38  ;;  %v638_v40 = vadd.f32 %v634_v39, %v1389_v37 }
 0x82c   :  { %1103 = vtanh.f32 %v638_v40 }
 0x837   :  { %v1102_v41 = vpop.eup %1101 }
 0x838   :  { %v641_v42 = vmul.f32 0.5, %v1102_v41 }
 0x839   :  { %v1104_v45 = vpop.eup %1103 }
 0x83a   :  { %v642_v44 = vadd.f32 0.5, %v641_v42  ;;  %v643_v30 = vmul.f32 0.5, %v1104_v45 }
 0x83c   :  { %v649_v46 = vmul.f32 %v1104_v45, %v642_v44  ;;  %v648_v26 = vmul.f32 %v646_v43, %v642_v44  ;;  %v644_v52 = vadd.f32 0.5, %v643_v30 }
 0x83e   :  { %651 = vrot.lane.b32.xlu0 %v649_v46, %s1153_s20 }
 0x8b0   :  { %v652_v51 = vpop.permute.xlu0 %651 }
 0x8b1   :  { %v654_v47 = vadd.f32 %v652_v51, %v648_v26 }
 0x8b3   :  { %1105 = vtanh.f32 %v654_v47 }
 0x8c0   :  { %v1106_v48 = vpop.eup %1105 }
 0x8c1   :  { %v656_v49 = vmul.f32 %v1106_v48, %v644_v52  ;;  %v63_v52 = vld [vmem:[#allocation2 + $0x118] sm:$0xff]  ;;  %v62_v48 = vld [vmem:[#allocation2 + $0x110] sm:$0xff] }
 0x8c2   :  { %995 = vmatprep.subr.mxu1 %v63_v52 }
 0x8c3   :  { %658 = vrot.lane.b32.xlu1 %v656_v49, %s1153_s20  ;;  %v61_v49 = vld [vmem:[#allocation2 + $0x108] sm:$0xff] }
 0x935   :  { %v659_v50 = vpop.permute.xlu1 %658 }
 0x936   :  { %1068 = vmatmul.mubr.msk.f32.vlgmr.msra.gmra.mxu0 %vm160_vm1, %v659_v50  ;;  %v60_v50 = vld [vmem:[#allocation2 + $0x100] sm:$0xff] }
 0x937   :  { %885 = vmatpush1.msra.mxu0 %v1181_v2  ;;  %932 = vmatprep.mubr.f32.mxu0 %v1152_v0 }
 0x938   :  { %886 = vmatprep.subr.mxu0 %v1183_v3 }
 0x939   :  { %887 = vmatpush1.msra.mxu0 %v1186_v4 }
 0x93a   :  { %888 = vmatprep.subr.mxu0 %v1189_v5 }
 0x93b   :  { %889 = vmatpush1.msra.mxu0 %v1192_v7 }
 0x93c   :  { %890 = vmatprep.subr.mxu0 %v1195_v9 }
 0x93d   :  { %891 = vmatpush1.msra.mxu0 %v1198_v12 }
 0x93e   :  { %892 = vmatprep.subr.mxu0 %v1204_v14 }
 0x93f   :  { %893 = vmatpush1.msra.mxu0 %v1207_v15  ;;  %v748_v15 = vrot.slane %v654_v47, 6 }
 0x940   :  { %894 = vmatprep.subr.mxu0 %v1211_v16 }
 0x941   :  { %895 = vmatpush1.msra.mxu0 %v1215_v17 }
 0x942   :  { %896 = vmatprep.subr.mxu0 %v1219_v18 }
 0x943   :  { %897 = vmatpush1.msra.mxu0 %v1223_v19 }
 0x944   :  { %898 = vmatprep.subr.mxu0 %v1227_v20 }
 0x945   :  { %899 = vmatpush1.msra.mxu0 %v1231_v21 }
 0x9f6   :  { %v728_v2 = vpop.f32.mrf.mxu0 }
 0x9f7   :  { %v735_v3 = vrot.slane %v728_v2, 6  ;;  %v58_v2 = vld [vmem:[#allocation2 + $0xf0] sm:$0xff] }
 0x9f8   :  { %v730_v4 = vpop.f32.mrf.mxu0 }
 0x9f9   :  { %v739_v5 = vadd.f32 %v735_v3, %v1385_v35  ;;  %v736_v7 = vrot.slane %v730_v4, 6  ;;  %v56_v3 = vld [vmem:[#allocation2 + $0xe0] sm:$0xff]  ;;  %v55_v4 = vld [vmem:[#allocation2 + $0xd8] sm:$0xff] }
 0x9fb   :  { %1107 = vtanh.f32 %v739_v5  ;;  %v740_v9 = vadd.f32 %v736_v7, %v1389_v37  ;;  %v54_v5 = vld [vmem:[#allocation2 + $0xd0] sm:$0xff]  ;;  %v53_v7 = vld [vmem:[#allocation2 + $0xc8] sm:$0xff] }
 0x9fd   :  { %1109 = vtanh.f32 %v740_v9  ;;  %v52_v9 = vld [vmem:[#allocation2 + $0xc0] sm:$0xff] }
 0xa08   :  { %v1108_v12 = vpop.eup %1107 }
 0xa09   :  { %v743_v14 = vmul.f32 0.5, %v1108_v12  ;;  %v51_v12 = vld [vmem:[#allocation2 + $0xb8] sm:$0xff] }
 0xa0a   :  { %v1110_v17 = vpop.eup %1109 }
 0xa0b   :  { %v744_v16 = vadd.f32 0.5, %v743_v14  ;;  %v745_v53 = vmul.f32 0.5, %v1110_v17  ;;  %v50_v14 = vld [vmem:[#allocation2 + $0xb0] sm:$0xff] }
 0xa0d   :  { %v751_v18 = vmul.f32 %v1110_v17, %v744_v16  ;;  %v750_v19 = vmul.f32 %v748_v15, %v744_v16  ;;  %v746_v54 = vadd.f32 0.5, %v745_v53  ;;  %v49_v15 = vld [vmem:[#allocation2 + $0xa8] sm:$0xff]  ;;  %v48_v16 = vld [vmem:[#allocation2 + $0xa0] sm:$0xff] }
 0xa0f   :  { %753 = vrot.lane.b32.xlu0 %v751_v18, %s1153_s20 }
 0xa81   :  { %v754_v20 = vpop.permute.xlu0 %753 }
 0xa82   :  { %v756_v21 = vadd.f32 %v754_v20, %v750_v19 }
 0xa84   :  { %1111 = vtanh.f32 %v756_v21  ;;  %v851_v11 = vrot.slane %v756_v21, 6 }
 0xa91   :  { %v1112_v55 = vpop.eup %1111 }
 0xa92   :  { %v758_v56 = vmul.f32 %v1112_v55, %v746_v54 }
 0xa94   :  { %v760_v57 = vrot.slane %v758_v56, 2  ;;  %v967_v56 = vsub.s32 1, %v1268_v23 }
 0xa96   :  { %761 = vrot.lane.b32.xlu1 %v760_v57, %s1153_s20  ;;  %v972_v57 = vrot.slane %v1276_v28, %v967_v56 }
 0xb08   :  { %v762_v58 = vpop.permute.xlu1 %761 }
 0xb09   :  { %1069 = vmatmul.mubr.msk.f32.vlgmr.msra.gmra.mxu1 %vm160_vm1, %v762_v58 }
 0xb0a   :  { %1043 = vmatprep.mubr.f32.mxu1 %v1152_v0  ;;  %996 = vmatpush1.msra.mxu1 %v62_v48 }
 0xb0b   :  { %997 = vmatprep.subr.mxu1 %v61_v49 }
 0xb0c   :  { %998 = vmatpush1.msra.mxu1 %v60_v50 }
 0xbc9   :  { %v831_v59 = vpop.f32.mrf.mxu1 }
 0xbca   :  { %v838_v60 = vrot.slane %v831_v59, 4 }
 0xbcb   :  { %v833_v61 = vpop.f32.mrf.mxu1 }
 0xbcc   :  { %v842_v62 = vadd.f32 %v838_v60, %v1385_v35  ;;  %v839_v63 = vrot.slane %v833_v61, 4 }
 0xbce   :  { %1113 = vtanh.f32 %v842_v62  ;;  %v843_v6 = vadd.f32 %v839_v63, %v1389_v37  ;;  %v968_v63 = vrot.slane %v1271_v25, %v967_v56 }
 0xbd0   :  { %1115 = vtanh.f32 %v843_v6  ;;  %v1053_v6 = vld [vmem:[%s1439_s2] sm:$0x3] }
 0xbdb   :  { %v1114_v8 = vpop.eup %1113 }
 0xbdc   :  { %v846_v10 = vmul.f32 0.5, %v1114_v8 }
 0xbdd   :  { %v1116_v22 = vpop.eup %1115 }
 0xbde   :  { %v847_v13 = vadd.f32 0.5, %v846_v10  ;;  %v848_v31 = vmul.f32 0.5, %v1116_v22 }
 0xbe0   :  { %v854_v1 = vmul.f32 %v1116_v22, %v847_v13  ;;  %v853_v24 = vmul.f32 %v851_v11, %v847_v13  ;;  %v849_v29 = vadd.f32 0.5, %v848_v31 }
 0xbe2   :  { %856 = vrot.lane.b32.xlu0 %v854_v1, %s1153_s20 }
 0xc54   :  { %v857_v0 = vpop.permute.xlu0 %856 }
 0xc55   :  { %v859_v27 = vadd.f32 %v857_v0, %v853_v24 }
 0xc57   :  { %1117 = vtanh.f32 %v859_v27  ;;  %v954_v46 = vrot.slane %v859_v27, 6 }
 0xc64   :  { %v1118_v32 = vpop.eup %1117 }
 0xc65   :  { %v861_v34 = vmul.f32 %v1118_v32, %v849_v29 }
 0xc67   :  { %v863_v33 = vrot.slane %v861_v34, 4 }
 0xc69   :  { %864 = vrot.lane.b32.xlu1 %v863_v33, %s1153_s20 }
 0xcdb   :  { %v865_v36 = vpop.permute.xlu1 %864 }
 0xcdc   :  { %1070 = vmatmul.mubr.msk.f32.vlgmr.msra.gmra.mxu0 %vm160_vm1, %v865_v36 }
 0xd9c   :  { %v934_v38 = vpop.f32.mrf.mxu0 }
 0xd9d   :  { %v941_v39 = vrot.slane %v934_v38, 2 }
 0xd9e   :  { %v936_v40 = vpop.f32.mrf.mxu0 }
 0xd9f   :  { %v945_v41 = vadd.f32 %v941_v39, %v1385_v35  ;;  %v942_v42 = vrot.slane %v936_v40, 2  ;;  %v59_v35 = vld [vmem:[#allocation2 + $0xf8] sm:$0xff] }
 0xda0   :  { %999 = vmatprep.subr.mxu1 %v59_v35 }
 0xda1   :  { %1119 = vtanh.f32 %v945_v41  ;;  %v946_v43 = vadd.f32 %v942_v42, %v1389_v37  ;;  %v57_v37 = vld [vmem:[#allocation2 + $0xe8] sm:$0xff]  ;;  %1000 = vmatpush1.msra.mxu1 %v58_v2 }
 0xda2   :  { %1001 = vmatprep.subr.mxu1 %v57_v37 }
 0xda3   :  { %1121 = vtanh.f32 %v946_v43  ;;  %1002 = vmatpush1.msra.mxu1 %v56_v3 }
 0xda4   :  { %1003 = vmatprep.subr.mxu1 %v55_v4 }
 0xda5   :  { %1004 = vmatpush1.msra.mxu1 %v54_v5 }
 0xda6   :  { %1005 = vmatprep.subr.mxu1 %v53_v7 }
 0xda7   :  { %1006 = vmatpush1.msra.mxu1 %v52_v9 }
 0xda8   :  { %1007 = vmatprep.subr.mxu1 %v51_v12 }
 0xda9   :  { %1008 = vmatpush1.msra.mxu1 %v50_v14 }
 0xdaa   :  { %1009 = vmatprep.subr.mxu1 %v49_v15 }
 0xdab   :  { %1010 = vmatpush1.msra.mxu1 %v48_v16 }
 0xdae   :  { %v1120_v44 = vpop.eup %1119 }
 0xdaf   :  { %v949_v45 = vmul.f32 0.5, %v1120_v44 }
 0xdb0   :  { %v1122_v51 = vpop.eup %1121 }
 0xdb1   :  { %v950_v26 = vadd.f32 0.5, %v949_v45  ;;  %v951_v19 = vmul.f32 0.5, %v1122_v51 }
 0xdb3   :  { %v957_v47 = vmul.f32 %v1122_v51, %v950_v26  ;;  %v956_v30 = vmul.f32 %v954_v46, %v950_v26  ;;  %v952_v20 = vadd.f32 0.5, %v951_v19 }
 0xdb5   :  { %959 = vrot.lane.b32.xlu0 %v957_v47, %s1153_s20 }
 0xe27   :  { %v960_v17 = vpop.permute.xlu0 %959 }
 0xe28   :  { %v962_v18 = vadd.f32 %v960_v17, %v956_v30 }
 0xe2a   :  { %1123 = vtanh.f32 %v962_v18 }
 0xe37   :  { %v1124_v21 = vpop.eup %1123 }
 0xe38   :  { %v964_v53 = vmul.f32 %v1124_v21, %v952_v20 }
 0xe3a   :  { %v974_v54 = vrot.slane %v964_v53, 6 }
 0xe3c   :  { %975 = vrot.lane.b32.xlu1 %v974_v54, %s1153_s20 }
 0xeae   :  { %v976_v55 = vpop.permute.xlu1 %975 }
 0xeaf   :  { %1071 = vmatmul.mubr.msk.f32.vlgmr.msra.gmra.mxu1 %vm160_vm1, %v976_v55 }
 0xf6f   :  { %v1045_v58 = vpop.f32.mrf.mxu1 }
 0xf70   :  { %v1046_v10 = vadd.f32 %v1045_v58, %v968_v63 }
 0xf71   :  { %v1047_v59 = vpop.f32.mrf.mxu1 }
 0xf72   :  { %v1048_v60 = vadd.f32 %v1047_v59, %v972_v57 }
 0xf74   :  { %v1050_v61 = vmul.f32 0.5, %v1048_v60 }
 0xf76   :  { %v1051_v62 = vmul.f32 1.442695, %v1050_v61 }
 0xf78   :  { %1125 = vpow2.f32 %v1051_v62 }
 0xf85   :  { %v1126_v8 = vpop.eup %1125 }
 0xf86   :  { %v1054_v11 = vmul.f32 %v1126_v8, %v1053_v6 }
 0xf88   :  { %v1055_v13 = vadd.f32 %v1054_v11, %v1046_v10 }
 0xf8a   :  { %1056 = vst [vmem:[%s1440_s3] sm:$0x3] %v1055_v13 }
 0xf8b   :  { %1061 = vsyncpa [#allocation3], 1 }

</bundles_post_ra>
